<compile_context>
chip_gen: v7x
topology: tpu7x:2x2x1
jax: 0.10.0
libtpu: 0.0.40
codegen_flags: <defaults>
</compile_context>

<pallas_src>
import jax
import jax.numpy as jnp
from jax.experimental import pallas as pl
from jax.experimental.pallas import tpu as pltpu


HID_PAD = 128            # padded hidden width (real widths are 20 and 10)
LANE = 128
SUBLANE = 8
MAX_TB = 512             # 512-row tiles already reach ~85% of the HBM roofline
TARGET_BLOCKS = 4        # aim for >= 4 batch tiles so DMA/compute can overlap


def _round_up(n, m):
    return ((n + m - 1) // m) * m


def _round_down(n, m):
    return (n // m) * m


def _vmem_capacity_bytes():
    # Per-generation VMEM (v5e/v6e: 128 MiB, v7x: 64 MiB per TensorCore).
    try:
        return int(pltpu.get_tpu_info().vmem_capacity_bytes)
    except Exception:
        return 64 * 1024 * 1024   # conservative fallback = v7x


def _pad2(a, rows, cols):
    r, c = a.shape
    return jnp.pad(a, ((0, rows - r), (0, cols - c)))


def prepare_params(params, stream_dtype=jnp.bfloat16):
    """One-time (off the hot path) parameter prep: zero-pad the hidden widths to 128 lanes
    (exact math, see header) and cast the weights to the bf16 streaming dtype.  Biases stay
    f32 — they are added straight onto the f32 accumulator."""
    M = params["w1"].shape[0]
    return dict(
        w1=_pad2(params["w1"], M, HID_PAD).astype(stream_dtype),
        b1=_pad2(params["b1"], 1, HID_PAD).astype(jnp.float32),
        w2=_pad2(params["w2"], HID_PAD, HID_PAD).astype(stream_dtype),
        b2=_pad2(params["b2"], 1, HID_PAD).astype(jnp.float32),
        w3=_pad2(params["w3"], HID_PAD, HID_PAD).astype(stream_dtype),
        b3=_pad2(params["b3"], 1, HID_PAD).astype(jnp.float32),
        w4=_pad2(params["w4"], HID_PAD, M).astype(stream_dtype),
        b4=_pad2(params["b4"], 1, M).astype(jnp.float32),
    )


def sae_kernel(x_ref, w1_ref, b1_ref, w2_ref, b2_ref, w3_ref, b3_ref,
               w4_ref, b4_ref, o_ref):
    # Fused forward for one (TB, M) batch tile: 4 bf16 MXU matmuls (f32 accumulation)
    # + bias adds + 3 f32 sigmoids, all resident in VMEM — intermediates never touch HBM.
    cdt = w2_ref.dtype                              # bf16: native MXU input dtype
    x = x_ref[...]

    h = jnp.dot(x, w1_ref[...], preferred_element_type=jnp.float32) + b1_ref[...]
    h = jax.nn.sigmoid(h)                           # f32 sigmoid (v5e VPU/EUP have no bf16)

    h = jnp.dot(h.astype(cdt), w2_ref[...], preferred_element_type=jnp.float32) + b2_ref[...]
    h = jax.nn.sigmoid(h)

    h = jnp.dot(h.astype(cdt), w3_ref[...], preferred_element_type=jnp.float32) + b3_ref[...]
    h = jax.nn.sigmoid(h)

    out = jnp.dot(h.astype(cdt), w4_ref[...], preferred_element_type=jnp.float32) + b4_ref[...]
    o_ref[...] = out.astype(o_ref.dtype)            # bf16 store: halves writeback + vst count


def _choose_tb(B, M, x_itemsize, out_itemsize, resident_bytes, vmem_cap):
    """Largest batch tile (multiple of 8, <= MAX_TB) whose double-buffered x + out tiles fit in
    the per-generation VMEM budget after resident weights, while keeping >= TARGET_BLOCKS grid
    blocks when the batch allows it (so the pipeline has something to overlap)."""
    per_row = 2 * M * x_itemsize + 2 * M * out_itemsize      # 2 x-buffers + 2 out-buffers
    budget = int(vmem_cap * 0.8) - resident_bytes - (4 << 20)  # headroom + compiler scratch
    tb_vmem = _round_down(max(budget, 0) // per_row, SUBLANE)
    tb_blocks = _round_down(pl.cdiv(B, TARGET_BLOCKS), SUBLANE)
    tb = min(max(tb_vmem, SUBLANE), MAX_TB, max(tb_blocks, SUBLANE),
             _round_up(B, SUBLANE))
    return max(tb, SUBLANE)


def sae_forward(x, padded_params, out_dtype=None):
    """x: (B, nb_movies), any float dtype (bf16 recommended — it is streamed as-is, no cast/pad).
    padded_params: output of prepare_params().  Returns (B, nb_movies) in out_dtype
    (defaults to x.dtype)."""
    p = padded_params
    B, M = x.shape
    assert p["w1"].shape == (M, HID_PAD), "params were not prepared for this nb_movies"
    out_dtype = x.dtype if out_dtype is None else out_dtype

    vmem_cap = _vmem_capacity_bytes()
    # The resident weights/biases are double-buffered by the auto-pipeliner even though their
    # index_map is constant -> count them twice in the budget.
    # TODO(synk): pipeline_mode=pl.Buffered(1) on the resident specs would halve this footprint.
    resident_bytes = 2 * sum(int(v.size) * v.dtype.itemsize for v in p.values())
    TB = _choose_tb(B, M, jnp.dtype(x.dtype).itemsize, jnp.dtype(out_dtype).itemsize,
                    resident_bytes, vmem_cap)
    n_blocks = pl.cdiv(B, TB)

    def resident(shape):
        # Constant block index -> stays resident in VMEM across the whole grid (never re-fetched).
        return pl.BlockSpec(shape, lambda i: (0, 0))

    out = pl.pallas_call(
        sae_kernel,
        out_shape=jax.ShapeDtypeStruct((B, M), out_dtype),
        grid_spec=pltpu.PrefetchScalarGridSpec(
            num_scalar_prefetch=0,
            grid=(n_blocks,),
            in_specs=[
                # x streams by batch tile; last dim equals the full (unpadded) array dim.
                pl.BlockSpec((TB, M), lambda i: (i, 0)),
                resident(p["w1"].shape), resident(p["b1"].shape),
                resident(p["w2"].shape), resident(p["b2"].shape),
                resident(p["w3"].shape), resident(p["b3"].shape),
                resident(p["w4"].shape), resident(p["b4"].shape),
            ],
            out_specs=pl.BlockSpec((TB, M), lambda i: (i, 0)),
        ),
        compiler_params=pltpu.CompilerParams(
            # Batch tiles are independent.
            # TODO(synk): on v7x, check xprof and switch to pltpu.CORE_PARALLEL if one TC idles.
            dimension_semantics=("parallel",),
            vmem_limit_bytes=int(vmem_cap * 0.85),
        ),
    )(x, p["w1"], p["b1"], p["w2"], p["b2"], p["w3"], p["b3"], p["w4"], p["b4"])
    return out


def init_params(key, nb_movies, h1=20, h2=10):
    # PyTorch Linear default init: U(-1/sqrt(fan_in), 1/sqrt(fan_in)); weights stored (in, out).
    keys = jax.random.split(key, 8)

    def lin(kw, kb, fan_in, fan_out):
        bound = 1.0 / jnp.sqrt(fan_in)
        w = jax.random.uniform(kw, (fan_in, fan_out), jnp.float32, -bound, bound)
        b = jax.random.uniform(kb, (1, fan_out), jnp.float32, -bound, bound)
        return w, b

    w1, b1 = lin(keys[0], keys[1], nb_movies, h1)
    w2, b2 = lin(keys[2], keys[3], h1, h2)
    w3, b3 = lin(keys[4], keys[5], h2, h1)
    w4, b4 = lin(keys[6], keys[7], h1, nb_movies)
    return dict(w1=w1, b1=b1, w2=w2, b2=b2, w3=w3, b3=b3, w4=w4, b4=b4)


def sae_reference(x, p):
    # Pure-XLA forward mirroring the kernel's quantization points (bf16 operands, f32
    # accumulation / sigmoids) on the prepared (padded) params — used for the self-test.
    f32 = jnp.float32
    h = jax.nn.sigmoid(jnp.dot(x, p["w1"], preferred_element_type=f32) + p["b1"])
    h = jax.nn.sigmoid(jnp.dot(h.astype(p["w2"].dtype), p["w2"],
                               preferred_element_type=f32) + p["b2"])
    h = jax.nn.sigmoid(jnp.dot(h.astype(p["w3"].dtype), p["w3"],
                               preferred_element_type=f32) + p["b3"])
    return jnp.dot(h.astype(p["w4"].dtype), p["w4"], preferred_element_type=f32) + p["b4"]


if __name__ == "__main__":
    nb_movies = 200     # deliberately NOT a multiple of 128: exercises the unpadded feature path
    batch = 8

    key = jax.random.PRNGKey(0)
    k_x, k_p = jax.random.split(key)
    params_f32 = init_params(k_p, nb_movies)
    params = prepare_params(params_f32)            # one-time: pad hidden dims + cast to bf16

    # ratings-like input in [0, 5], streamed as bf16
    x = jax.random.uniform(k_x, (batch, nb_movies), jnp.float32, 0.0, 5.0).astype(jnp.bfloat16)

    out = sae_forward(x, params)
    out = jax.block_until_ready(out)

    ref = sae_reference(x, params)
    assert out.shape == (batch, nb_movies)
    # bf16 streaming/output -> relaxed tolerance vs the quantization-matched XLA reference.
    assert jnp.allclose(out.astype(jnp.float32), ref.astype(jnp.float32),
                        atol=2e-2, rtol=2e-2), "mismatch vs pure-JAX reference"
    print("KERNEL_OK")
</pallas_src>

<mosaic_0001>
module attributes {stable_mosaic.version = 11 : i64} {
  func.func @sae_kernel(%arg0: i32, %arg1: memref<8x200xbf16, #tpu.memory_space<vmem>>, %arg2: memref<200x128xbf16, #tpu.memory_space<vmem>>, %arg3: memref<1x128xf32, #tpu.memory_space<vmem>>, %arg4: memref<128x128xbf16, #tpu.memory_space<vmem>>, %arg5: memref<1x128xf32, #tpu.memory_space<vmem>>, %arg6: memref<128x128xbf16, #tpu.memory_space<vmem>>, %arg7: memref<1x128xf32, #tpu.memory_space<vmem>>, %arg8: memref<128x200xbf16, #tpu.memory_space<vmem>>, %arg9: memref<1x200xf32, #tpu.memory_space<vmem>>, %arg10: memref<8x200xbf16, #tpu.memory_space<vmem>>) attributes {dimension_semantics = [#tpu.dimension_semantics<parallel>], iteration_bounds = array<i64: 1>, scalar_prefetch = 0 : i64, scratch_operands = 0 : i64, tpu.core_type = #tpu.core_type<tc>, window_params = [{transform_indices = @transform_0, window_bounds = array<i64: 8, 200>}, {pipeline_mode = #tpu.pipeline_mode<synchronous>, transform_indices = @transform_1, window_bounds = array<i64: 200, 128>}, {pipeline_mode = #tpu.pipeline_mode<synchronous>, transform_indices = @transform_2, window_bounds = array<i64: 1, 128>}, {pipeline_mode = #tpu.pipeline_mode<synchronous>, transform_indices = @transform_3, window_bounds = array<i64: 128, 128>}, {pipeline_mode = #tpu.pipeline_mode<synchronous>, transform_indices = @transform_4, window_bounds = array<i64: 1, 128>}, {pipeline_mode = #tpu.pipeline_mode<synchronous>, transform_indices = @transform_5, window_bounds = array<i64: 128, 128>}, {pipeline_mode = #tpu.pipeline_mode<synchronous>, transform_indices = @transform_6, window_bounds = array<i64: 1, 128>}, {pipeline_mode = #tpu.pipeline_mode<synchronous>, transform_indices = @transform_7, window_bounds = array<i64: 128, 200>}, {pipeline_mode = #tpu.pipeline_mode<synchronous>, transform_indices = @transform_8, window_bounds = array<i64: 1, 200>}, {transform_indices = @transform_9, window_bounds = array<i64: 8, 200>}]} {
    %c0 = arith.constant 0 : index
    %c0_0 = arith.constant 0 : index
    %0 = vector.load %arg1[%c0, %c0_0] : memref<8x200xbf16, #tpu.memory_space<vmem>>, vector<8x200xbf16>
    %c0_1 = arith.constant 0 : index
    %c0_2 = arith.constant 0 : index
    %1 = vector.load %arg2[%c0_1, %c0_2] : memref<200x128xbf16, #tpu.memory_space<vmem>>, vector<200x128xbf16>
    %cst = arith.constant dense<0.000000e+00> : vector<8x128xf32>
    %2 = tpu.matmul %0, %1, %cst {dimension_numbers = #tpu.dot_dimension_numbers<[1], [0], [0], [1], [0, 0, 1, 1], [], []>} : vector<8x200xbf16>, vector<200x128xbf16>, vector<8x128xf32> -> vector<8x128xf32>
    %c0_3 = arith.constant 0 : index
    %c0_4 = arith.constant 0 : index
    %3 = vector.load %arg3[%c0_3, %c0_4] : memref<1x128xf32, #tpu.memory_space<vmem>>, vector<1x128xf32>
    %4 = vector.broadcast %3 : vector<1x128xf32> to vector<8x128xf32>
    %5 = arith.addf %2, %4 : vector<8x128xf32>
    %6 = arith.negf %5 : vector<8x128xf32>
    %7 = math.exp %6 : vector<8x128xf32>
    %cst_5 = arith.constant 1.000000e+00 : f32
    %8 = vector.broadcast %cst_5 : f32 to vector<8x128xf32>
    %9 = arith.addf %8, %7 : vector<8x128xf32>
    %10 = arith.divf %8, %9 : vector<8x128xf32>
    %11 = arith.truncf %10 : vector<8x128xf32> to vector<8x128xbf16>
    %c0_6 = arith.constant 0 : index
    %c0_7 = arith.constant 0 : index
    %12 = vector.load %arg4[%c0_6, %c0_7] : memref<128x128xbf16, #tpu.memory_space<vmem>>, vector<128x128xbf16>
    %cst_8 = arith.constant dense<0.000000e+00> : vector<8x128xf32>
    %13 = tpu.matmul %11, %12, %cst_8 {dimension_numbers = #tpu.dot_dimension_numbers<[1], [0], [0], [1], [0, 0, 1, 1], [], []>} : vector<8x128xbf16>, vector<128x128xbf16>, vector<8x128xf32> -> vector<8x128xf32>
    %c0_9 = arith.constant 0 : index
    %c0_10 = arith.constant 0 : index
    %14 = vector.load %arg5[%c0_9, %c0_10] : memref<1x128xf32, #tpu.memory_space<vmem>>, vector<1x128xf32>
    %15 = vector.broadcast %14 : vector<1x128xf32> to vector<8x128xf32>
    %16 = arith.addf %13, %15 : vector<8x128xf32>
    %17 = arith.negf %16 : vector<8x128xf32>
    %18 = math.exp %17 : vector<8x128xf32>
    %cst_11 = arith.constant 1.000000e+00 : f32
    %19 = vector.broadcast %cst_11 : f32 to vector<8x128xf32>
    %20 = arith.addf %19, %18 : vector<8x128xf32>
    %21 = arith.divf %19, %20 : vector<8x128xf32>
    %22 = arith.truncf %21 : vector<8x128xf32> to vector<8x128xbf16>
    %c0_12 = arith.constant 0 : index
    %c0_13 = arith.constant 0 : index
    %23 = vector.load %arg6[%c0_12, %c0_13] : memref<128x128xbf16, #tpu.memory_space<vmem>>, vector<128x128xbf16>
    %cst_14 = arith.constant dense<0.000000e+00> : vector<8x128xf32>
    %24 = tpu.matmul %22, %23, %cst_14 {dimension_numbers = #tpu.dot_dimension_numbers<[1], [0], [0], [1], [0, 0, 1, 1], [], []>} : vector<8x128xbf16>, vector<128x128xbf16>, vector<8x128xf32> -> vector<8x128xf32>
    %c0_15 = arith.constant 0 : index
    %c0_16 = arith.constant 0 : index
    %25 = vector.load %arg7[%c0_15, %c0_16] : memref<1x128xf32, #tpu.memory_space<vmem>>, vector<1x128xf32>
    %26 = vector.broadcast %25 : vector<1x128xf32> to vector<8x128xf32>
    %27 = arith.addf %24, %26 : vector<8x128xf32>
    %28 = arith.negf %27 : vector<8x128xf32>
    %29 = math.exp %28 : vector<8x128xf32>
    %cst_17 = arith.constant 1.000000e+00 : f32
    %30 = vector.broadcast %cst_17 : f32 to vector<8x128xf32>
    %31 = arith.addf %30, %29 : vector<8x128xf32>
    %32 = arith.divf %30, %31 : vector<8x128xf32>
    %33 = arith.truncf %32 : vector<8x128xf32> to vector<8x128xbf16>
    %c0_18 = arith.constant 0 : index
    %c0_19 = arith.constant 0 : index
    %34 = vector.load %arg8[%c0_18, %c0_19] : memref<128x200xbf16, #tpu.memory_space<vmem>>, vector<128x200xbf16>
    %cst_20 = arith.constant dense<0.000000e+00> : vector<8x200xf32>
    %35 = tpu.matmul %33, %34, %cst_20 {dimension_numbers = #tpu.dot_dimension_numbers<[1], [0], [0], [1], [0, 0, 1, 1], [], []>} : vector<8x128xbf16>, vector<128x200xbf16>, vector<8x200xf32> -> vector<8x200xf32>
    %c0_21 = arith.constant 0 : index
    %c0_22 = arith.constant 0 : index
    %36 = vector.load %arg9[%c0_21, %c0_22] : memref<1x200xf32, #tpu.memory_space<vmem>>, vector<1x200xf32>
    %37 = vector.broadcast %36 : vector<1x200xf32> to vector<8x200xf32>
    %38 = arith.addf %35, %37 : vector<8x200xf32>
    %39 = arith.truncf %38 : vector<8x200xf32> to vector<8x200xbf16>
    %c0_23 = arith.constant 0 : index
    %c0_24 = arith.constant 0 : index
    %40 = vector.load %arg10[%c0_23, %c0_24] : memref<8x200xbf16, #tpu.memory_space<vmem>>, vector<8x200xbf16>
    tpu.vector_store %arg10[%c0_23, %c0_24], %39 {strides = array<i32>} : memref<8x200xbf16, #tpu.memory_space<vmem>>, vector<8x200xbf16>,
    return
  }
  func.func @transform_0(%arg0: i32) -> (i32, i32) {
    %c0_i32 = arith.constant 0 : i32
    %c0_i32_0 = arith.constant 0 : i32
    return %arg0, %c0_i32 : i32, i32
  }
  func.func @transform_1(%arg0: i32) -> (i32, i32) {
    %c0_i32 = arith.constant 0 : i32
    %c0_i32_0 = arith.constant 0 : i32
    %c0_i32_1 = arith.constant 0 : i32
    return %c0_i32, %c0_i32_0 : i32, i32
  }
  func.func @transform_2(%arg0: i32) -> (i32, i32) {
    %c0_i32 = arith.constant 0 : i32
    %c0_i32_0 = arith.constant 0 : i32
    %c0_i32_1 = arith.constant 0 : i32
    return %c0_i32, %c0_i32_0 : i32, i32
  }
  func.func @transform_3(%arg0: i32) -> (i32, i32) {
    %c0_i32 = arith.constant 0 : i32
    %c0_i32_0 = arith.constant 0 : i32
    %c0_i32_1 = arith.constant 0 : i32
    return %c0_i32, %c0_i32_0 : i32, i32
  }
  func.func @transform_4(%arg0: i32) -> (i32, i32) {
    %c0_i32 = arith.constant 0 : i32
    %c0_i32_0 = arith.constant 0 : i32
    %c0_i32_1 = arith.constant 0 : i32
    return %c0_i32, %c0_i32_0 : i32, i32
  }
  func.func @transform_5(%arg0: i32) -> (i32, i32) {
    %c0_i32 = arith.constant 0 : i32
    %c0_i32_0 = arith.constant 0 : i32
    %c0_i32_1 = arith.constant 0 : i32
    return %c0_i32, %c0_i32_0 : i32, i32
  }
  func.func @transform_6(%arg0: i32) -> (i32, i32) {
    %c0_i32 = arith.constant 0 : i32
    %c0_i32_0 = arith.constant 0 : i32
    %c0_i32_1 = arith.constant 0 : i32
    return %c0_i32, %c0_i32_0 : i32, i32
  }
  func.func @transform_7(%arg0: i32) -> (i32, i32) {
    %c0_i32 = arith.constant 0 : i32
    %c0_i32_0 = arith.constant 0 : i32
    %c0_i32_1 = arith.constant 0 : i32
    return %c0_i32, %c0_i32_0 : i32, i32
  }
  func.func @transform_8(%arg0: i32) -> (i32, i32) {
    %c0_i32 = arith.constant 0 : i32
    %c0_i32_0 = arith.constant 0 : i32
    %c0_i32_1 = arith.constant 0 : i32
    return %c0_i32, %c0_i32_0 : i32, i32
  }
  func.func @transform_9(%arg0: i32) -> (i32, i32) {
    %c0_i32 = arith.constant 0 : i32
    %c0_i32_0 = arith.constant 0 : i32
    return %arg0, %c0_i32 : i32, i32
  }
}

</mosaic_0001>

<bundles_post_ra>
// kernel: tpu_custom_call.1
= control target key start
LH: loop header
LB: loop body
LE: loop exit
PB: predicated region body
PF: predicated region fallthrough
CT: control target
= control target key end

     0   :  { %14 = vsyncpa [#allocation3], 0  ;;  %s1108_s0 = inlined_call_operand.hbm [shape: bf16[8,200], index: 0, kind: input, shape index: {}]   ;;  %s1109_s1 = inlined_call_operand.vmem [shape: bf16[200,128], index: 1, kind: input, shape index: {}]   ;;  %s1110_s2 = inlined_call_operand.vmem [shape: f32[1,128], index: 2, kind: input, shape index: {}]   ;;  %s1111_s3 = inlined_call_operand.vmem [shape: bf16[128,128], index: 3, kind: input, shape index: {}]   ;;  %s1112_s4 = inlined_call_operand.vmem [shape: f32[1,128], index: 4, kind: input, shape index: {}]   ;;  %s1113_s5 = inlined_call_operand.vmem [shape: bf16[128,128], index: 5, kind: input, shape index: {}]   ;;  %s1114_s6 = inlined_call_operand.vmem [shape: f32[1,128], index: 6, kind: input, shape index: {}]   ;;  %s1115_s7 = inlined_call_operand.vmem [shape: bf16[128,200], index: 7, kind: input, shape index: {}]   ;;  %s1116_s8 = inlined_call_operand.vmem [shape: f32[1,200], index: 8, kind: input, shape index: {}]   ;;  %s1117_s9 = inlined_call_operand.hbm [shape: bf16[8,200], index: 9, kind: output, shape index: {}]  }
   0x1   :  { %15 = vsyncpa [#allocation4], 0  ;;  %s860_s30 = smov [#allocation2]   ;;  %s812_s13 = scalar_lea.hbm %s1108_s0, 128 }
   0x2   :  { %s22_s10 = sshll.u32 %s860_s30, 4  ;;  %p813_p0 = scmp.ne.s32.totalorder %s1108_s0, %s812_s13  ;;  %s23_s10 = int_to_ptr.vmem [resolvable:$true] %s22_s10 }
   0x3   :  { %p816_p1 = scmp.lt.u32.totalorder %s812_s13, %s1108_s0 }
   0x5   :  { %p818_p2 = pnand %p816_p1, %p813_p0 }
   0x7   :  { %821 = shalt.err (!%p818_p2)
}
   0x8   :  { %s822_s18 = scalar_lea.vmem %s23_s10, 128  ;;  %p827_p4 = scmp.lt.s32.totalorder %s23_s10, %s23_s10 }
   0x9   :  { %p823_p3 = scmp.ne.s32.totalorder %s23_s10, %s822_s18  ;;  %p828_p5 = scmp.lt.s32.totalorder %s822_s18, %s822_s18 }
   0xb   :  { %p829_p6 = por %p828_p5, %p827_p4 }
   0xd   :  { %p830_p7 = pnand %p829_p6, %p823_p3 }
   0xf   :  { %833 = shalt.err (!%p830_p7)
}
  0x10   :  { %25 = dma.hbm_to_vmem [thread:$0]  %s1108_s0, 128, %s23_s10, [#allocation3]  }
  0x11   :  { %856 = dma.done.wait [#allocation3], 128  }
  0x12   :  { %857 = vsyncadd [#allocation3], 4294967168  ;;  %v861_v0 = vmov 0   ;;  %v862_v1 = vmov 0.0   ;;  %v745_v2 = vld [vmem:[%s1109_s1] sm:$0xff]   ;;  %v746_v3 = vld [vmem:[%s1109_s1 + $0x8] sm:$0xff]  }
  0x13   :  { %168 = vmatprep.subr.bf16.mxu0 %v861_v0  ;;  %700 = vmatprep.subr.bf16.mxu1 %v862_v1  ;;  %v747_v4 = vld [vmem:[%s1109_s1 + $0x10] sm:$0xff]   ;;  %v748_v5 = vld [vmem:[%s1109_s1 + $0x18] sm:$0xff]   ;;  %v46_v6 = vld [vmem:[#allocation2] sm:$0xff]  ;;  %vm160_vm0 = vcmask 588800   ;;  %vm164_vm1 = vcmask 1043456   ;;  %vm863_vm2 = vmmov 0  }
  0x14   :  { %169 = vmatpush1.bf16.msra.mxu0 %v745_v2  ;;  %v749_v7 = vld [vmem:[%s1109_s1 + $0x20] sm:$0xff]   ;;  %v628_v8 = vcombine.high %v46_v6, %v46_v6  ;;  %v750_v9 = vld [vmem:[%s1109_s1 + $0x28] sm:$0xff]   ;;  %v751_v10 = vld [vmem:[%s1109_s1 + $0x30] sm:$0xff]   ;;  %v627_v18 = vcombine.low %v46_v6, %v46_v6  ;;  %716 = vmatprep.mubr.msk.bf16.mxu1 %vm863_vm2, %v862_v1  ;;  %vm608_vm3 = vcmask 588804  }
  0x15   :  { %170 = vmatprep.subr.bf16.mxu0 %v861_v0  ;;  %v752_v11 = vld [vmem:[%s1109_s1 + $0x38] sm:$0xff]   ;;  %v753_v12 = vld [vmem:[%s1109_s1 + $0x40] sm:$0xff]   ;;  %v754_v13 = vld [vmem:[%s1109_s1 + $0x48] sm:$0xff]  }
  0x16   :  { %642 = vmatprep.mubr.msk.bf16.mxu0 %vm160_vm0, %v628_v8  ;;  %v755_v14 = vld [vmem:[%s1109_s1 + $0x50] sm:$0xff]   ;;  %v756_v15 = vld [vmem:[%s1109_s1 + $0x58] sm:$0xff]   ;;  %v757_v16 = vld [vmem:[%s1109_s1 + $0x60] ss:$0 sps:$4 sm:$0xff]  }
  0x17   :  { %v166_v17 = vsel %vm164_vm1, %v757_v16, 0  ;;  %v760_v19 = vld [vmem:[%s1111_s3] sm:$0xff]   ;;  %v761_v20 = vld [vmem:[%s1111_s3 + $0x8] sm:$0xff]   ;;  %v762_v21 = vld [vmem:[%s1111_s3 + $0x10] sm:$0xff]  }
  0x18   :  { %171 = vmatpush1.bf16.msra.mxu0 %v746_v3  ;;  %701 = vmatpush3.bf16.msra.mxu1 %v760_v19  ;;  %v763_v22 = vld [vmem:[%s1111_s3 + $0x18] sm:$0xff]   ;;  %v764_v23 = vld [vmem:[%s1111_s3 + $0x20] sm:$0xff]   ;;  %v765_v24 = vld [vmem:[%s1111_s3 + $0x28] sm:$0xff]  }
  0x19   :  { %172 = vmatprep.subr.bf16.mxu0 %v861_v0  ;;  %702 = vmatprep.subr.bf16.mxu1 %v862_v1  ;;  %v766_v25 = vld [vmem:[%s1111_s3 + $0x30] sm:$0xff]   ;;  %v767_v26 = vld [vmem:[%s1111_s3 + $0x38] sm:$0xff]   ;;  %v626_v27 = vld [vmem:[%s1110_s2] ss:$0 sm:$0xff] }
  0x1a   :  { %v768_v38 = vld [vmem:[%s1113_s5] sm:$0xff]   ;;  %v769_v39 = vld [vmem:[%s1113_s5 + $0x8] sm:$0xff]   ;;  %v770_v40 = vld [vmem:[%s1113_s5 + $0x10] sm:$0xff]  }
  0x1b   :  { %v771_v41 = vld [vmem:[%s1113_s5 + $0x18] sm:$0xff]   ;;  %v772_v42 = vld [vmem:[%s1113_s5 + $0x20] sm:$0xff]   ;;  %v773_v43 = vld [vmem:[%s1113_s5 + $0x28] sm:$0xff]  }
  0x1c   :  { %173 = vmatpush1.bf16.msra.mxu0 %v747_v4  ;;  %703 = vmatpush3.bf16.msra.mxu1 %v761_v20  ;;  %v774_v44 = vld [vmem:[%s1113_s5 + $0x30] sm:$0xff]   ;;  %v775_v45 = vld [vmem:[%s1113_s5 + $0x38] sm:$0xff]   ;;  %v776_v46 = vld [vmem:[%s1115_s7] ss:$8 sps:$4 sm:$0xff]   ;;  %v469_v20 = vlaneseq }
  0x1d   :  { %174 = vmatprep.subr.bf16.mxu0 %v861_v0  ;;  %704 = vmatprep.subr.bf16.mxu1 %v862_v1  ;;  %v778_v47 = vld [vmem:[%s1115_s7 + $0x4] ss:$8 sps:$4 sm:$0xff]   ;;  %v644_v48 = vld [vmem:[%s1112_s4] ss:$0 sm:$0xff]  ;;  %v781_v59 = vld [vmem:[%s1115_s7 + $0x14] ss:$8 sps:$4 sm:$0xff]  }
  0x1e   :  { %v779_v60 = vld [vmem:[%s1115_s7 + $0x10] ss:$8 sps:$4 sm:$0xff]   ;;  %v784_v61 = vld [vmem:[%s1115_s7 + $0x24] ss:$8 sps:$4 sm:$0xff]   ;;  %v782_v62 = vld [vmem:[%s1115_s7 + $0x20] ss:$8 sps:$4 sm:$0xff]  }
  0x1f   :  { %v787_v63 = vld [vmem:[%s1115_s7 + $0x34] ss:$8 sps:$4 sm:$0xff]   ;;  %v788_v2 = vld [vmem:[%s1115_s7 + $0x40] ss:$8 sps:$4 sm:$0xff]   ;;  %v791_v4 = vld [vmem:[%s1115_s7 + $0x50] ss:$8 sps:$4 sm:$0xff]  }
  0x20   :  { %175 = vmatpush1.bf16.msra.mxu0 %v748_v5  ;;  %705 = vmatpush3.bf16.msra.mxu1 %v762_v21  ;;  %v793_v3 = vld [vmem:[%s1115_s7 + $0x54] ss:$8 sps:$4 sm:$0xff]   ;;  %v796_v5 = vld [vmem:[%s1115_s7 + $0x64] ss:$8 sps:$4 sm:$0xff]   ;;  %v794_v6 = vld [vmem:[%s1115_s7 + $0x60] ss:$8 sps:$4 sm:$0xff]  }
  0x21   :  { %176 = vmatprep.subr.bf16.mxu0 %v861_v0  ;;  %706 = vmatprep.subr.bf16.mxu1 %v862_v1  ;;  %v797_v8 = vld [vmem:[%s1115_s7 + $0x70] ss:$8 sps:$4 sm:$0xff]   ;;  %v470_v21 = vshrl.u32 %v469_v20, 7  ;;  %vm609_vm4 = vmor %vm608_vm3, %vm164_vm1 }
  0x24   :  { %177 = vmatpush1.bf16.msra.mxu0 %v749_v7  ;;  %707 = vmatpush3.bf16.msra.mxu1 %v763_v22  ;;  %v799_v7 = vld [vmem:[%s1115_s7 + $0x74] ss:$8 sps:$4 sm:$0xff]   ;;  %v471_v22 = vsub.s32 0, %v470_v21 }
  0x25   :  { %178 = vmatprep.subr.bf16.mxu0 %v861_v0  ;;  %708 = vmatprep.subr.bf16.mxu1 %v862_v1 }
  0x28   :  { %179 = vmatpush1.bf16.msra.mxu0 %v750_v9  ;;  %709 = vmatpush3.bf16.msra.mxu1 %v764_v23  ;;  %v654_v9 = vld [vmem:[%s1114_s6] ss:$0 sm:$0xff]  ;;  %s864_s6 = smov [#allocation5]  }
  0x29   :  { %180 = vmatprep.subr.bf16.mxu0 %v861_v0  ;;  %710 = vmatprep.subr.bf16.mxu1 %v862_v1  ;;  %v467_v23 = vld [vmem:[%s1116_s8] sm:$0x3]  ;;  %s617_s4 = sshll.u32 %s864_s6, 4  ;;  %s618_s4 = int_to_ptr.vmem [resolvable:$true] %s617_s4 }
  0x2a   :  { %s834_s3 = scalar_lea.vmem %s618_s4, 128  ;;  %p839_p9 = scmp.lt.s32.totalorder %s618_s4, %s618_s4 }
  0x2b   :  { %p835_p8 = scmp.ne.s32.totalorder %s618_s4, %s834_s3  ;;  %p840_p10 = scmp.lt.s32.totalorder %s834_s3, %s834_s3 }
  0x2c   :  { %181 = vmatpush1.bf16.msra.mxu0 %v751_v10  ;;  %711 = vmatpush3.bf16.msra.mxu1 %v765_v24  ;;  %v475_v24 = vsub.s32 1, %v470_v21 }
  0x2d   :  { %182 = vmatprep.subr.bf16.mxu0 %v861_v0  ;;  %712 = vmatprep.subr.bf16.mxu1 %v862_v1  ;;  %p841_p11 = por %p840_p10, %p839_p9 }
  0x2f   :  { %p842_p12 = pnand %p841_p11, %p835_p8 }
  0x30   :  { %183 = vmatpush1.bf16.msra.mxu0 %v752_v11  ;;  %713 = vmatpush3.bf16.msra.mxu1 %v766_v25  ;;  %v472_v25 = vrot.slane %v467_v23, %v471_v22 }
  0x31   :  { %184 = vmatprep.subr.bf16.mxu0 %v861_v0  ;;  %714 = vmatprep.subr.bf16.mxu1 %v862_v1 }
  0x34   :  { %185 = vmatpush1.bf16.msra.mxu0 %v753_v12  ;;  %715 = vmatpush3.bf16.msra.mxu1 %v767_v26  ;;  %v476_v26 = vrot.slane %v467_v23, %v475_v24 }
  0x35   :  { %186 = vmatprep.subr.bf16.mxu0 %v861_v0  ;;  %720 = vmatprep.subr.bf16.mxu1 %v862_v1 }
  0x38   :  { %187 = vmatpush1.bf16.msra.mxu0 %v754_v13 }
  0x39   :  { %188 = vmatprep.subr.bf16.mxu0 %v861_v0 }
  0x3c   :  { %189 = vmatpush1.bf16.msra.mxu0 %v755_v14 }
  0x3d   :  { %190 = vmatprep.subr.bf16.mxu0 %v861_v0 }
  0x40   :  { %191 = vmatpush1.bf16.msra.mxu0 %v756_v15 }
  0x41   :  { %192 = vmatprep.subr.bf16.mxu0 %v861_v0 }
  0x44   :  { %193 = vmatpush1.bf16.msra.mxu0 %v166_v17 }
  0x45   :  { %559 = vmatprep.subr.bf16.mxu0 %v778_v47 }
  0x47   :  { %201 = vmatmul.mubr.bf16.vlgmr.msra.gmra.mrb[0].mxu0 %v627_v18 }
  0x48   :  { %591 = vmatprep.mubr.bf16.mxu0 %v861_v0  ;;  %560 = vmatpush1.bf16.msra.mxu0 %v776_v46  ;;  %v785_v0 = vld [vmem:[%s1115_s7 + $0x30] ss:$8 sps:$4 sm:$0xff]  }
  0x49   :  { %561 = vmatprep.subr.bf16.mxu0 %v781_v59 }
  0x4c   :  { %562 = vmatpush1.bf16.msra.mxu0 %v779_v60 }
  0x4d   :  { %563 = vmatprep.subr.bf16.mxu0 %v784_v61 }
  0x50   :  { %564 = vmatpush1.bf16.msra.mxu0 %v782_v62 }
  0x51   :  { %565 = vmatprep.subr.bf16.mxu0 %v787_v63 }
  0x54   :  { %566 = vmatpush1.bf16.msra.mxu0 %v785_v0 }
 0x11a   :  { %v202_v28 = vpop.f32.mrb[0].mxu0 }
 0x11b   :  { %v203_v29 = vadd.f32 %v626_v27, %v202_v28  ;;  %v204_v30 = vpop.f32.mrb[1].mxu0 }
 0x11c   :  { %v205_v31 = vpop.f32.mrb[2].mxu0 }
 0x11d   :  { %v643_v32 = vmul.f32 -1.442695, %v203_v29  ;;  %v206_v33 = vpop.f32.mrb[3].mxu0 }
 0x11f   :  { %800 = vpow2.f32 %v643_v32 }
 0x129   :  { %v801_v34 = vpop.eup %800 }
 0x12a   :  { %v211_v35 = vadd.f32 1.0, %v801_v34 }
 0x12c   :  { %802 = vrcp.f32 %v211_v35 }
 0x136   :  { %v803_v36 = vpop.eup %802 }
 0x137   :  { %v214_v37 = vpack.c.bf16 %v803_v36, %v803_v36 }
 0x139   :  { %717 = vmatmul.mubr.bf16.vlgmr.msra.gmra.mrb[0].mxu1 %v214_v37 }
 0x13a   :  { %736 = vmatprep.mubr.msk.bf16.mxu1 %vm863_vm2, %v862_v1  ;;  %721 = vmatpush3.bf16.msra.mxu1 %v768_v38 }
 0x13b   :  { %722 = vmatprep.subr.bf16.mxu1 %v862_v1 }
 0x13e   :  { %723 = vmatpush3.bf16.msra.mxu1 %v769_v39 }
 0x13f   :  { %724 = vmatprep.subr.bf16.mxu1 %v862_v1 }
 0x142   :  { %725 = vmatpush3.bf16.msra.mxu1 %v770_v40 }
 0x143   :  { %726 = vmatprep.subr.bf16.mxu1 %v862_v1 }
 0x146   :  { %727 = vmatpush3.bf16.msra.mxu1 %v771_v41 }
 0x147   :  { %728 = vmatprep.subr.bf16.mxu1 %v862_v1 }
 0x14a   :  { %729 = vmatpush3.bf16.msra.mxu1 %v772_v42 }
 0x14b   :  { %730 = vmatprep.subr.bf16.mxu1 %v862_v1 }
 0x14e   :  { %731 = vmatpush3.bf16.msra.mxu1 %v773_v43 }
 0x14f   :  { %732 = vmatprep.subr.bf16.mxu1 %v862_v1 }
 0x152   :  { %733 = vmatpush3.bf16.msra.mxu1 %v774_v44 }
 0x153   :  { %734 = vmatprep.subr.bf16.mxu1 %v862_v1  ;;  %v790_v1 = vld [vmem:[%s1115_s7 + $0x44] ss:$8 sps:$4 sm:$0xff]  }
 0x154   :  { %567 = vmatprep.subr.bf16.mxu0 %v790_v1 }
 0x155   :  { %568 = vmatpush1.bf16.msra.mxu0 %v788_v2 }
 0x156   :  { %735 = vmatpush3.bf16.msra.mxu1 %v775_v45  ;;  %569 = vmatprep.subr.bf16.mxu0 %v793_v3 }
 0x159   :  { %570 = vmatpush1.bf16.msra.mxu0 %v791_v4 }
 0x15a   :  { %571 = vmatprep.subr.bf16.mxu0 %v796_v5 }
 0x15d   :  { %572 = vmatpush1.bf16.msra.mxu0 %v794_v6 }
 0x15e   :  { %573 = vmatprep.subr.bf16.mxu0 %v799_v7 }
 0x161   :  { %574 = vmatpush1.bf16.msra.mxu0 %v797_v8 }
 0x20c   :  { %v320_v49 = vpop.f32.mrb[0].mxu1 }
 0x20d   :  { %v321_v50 = vadd.f32 %v644_v48, %v320_v49  ;;  %v718_v51 = vpop.f32.mrb[1].mxu1 }
 0x20e   :  { %v323_v52 = vpop.f32.mrb[2].mxu1 }
 0x20f   :  { %v653_v53 = vmul.f32 -1.442695, %v321_v50  ;;  %v719_v54 = vpop.f32.mrb[3].mxu1 }
 0x211   :  { %804 = vpow2.f32 %v653_v53 }
 0x21b   :  { %v805_v55 = vpop.eup %804 }
 0x21c   :  { %v329_v56 = vadd.f32 1.0, %v805_v55 }
 0x21e   :  { %806 = vrcp.f32 %v329_v56 }
 0x228   :  { %v807_v57 = vpop.eup %806 }
 0x229   :  { %v332_v58 = vpack.c.bf16 %v807_v57, %v807_v57 }
 0x22b   :  { %737 = vmatmul.mubr.bf16.vlgmr.msra.gmra.mrb[4].mxu1 %v332_v58 }
 0x2fe   :  { %v438_v10 = vpop.f32.mrb[4].mxu1 }
 0x2ff   :  { %v439_v11 = vadd.f32 %v654_v9, %v438_v10  ;;  %v738_v12 = vpop.f32.mrb[5].mxu1 }
 0x300   :  { %v441_v13 = vpop.f32.mrb[6].mxu1 }
 0x301   :  { %v663_v14 = vmul.f32 -1.442695, %v439_v11  ;;  %v739_v15 = vpop.f32.mrb[7].mxu1 }
 0x303   :  { %808 = vpow2.f32 %v663_v14 }
 0x30d   :  { %v809_v16 = vpop.eup %808 }
 0x30e   :  { %v447_v17 = vadd.f32 1.0, %v809_v16 }
 0x310   :  { %810 = vrcp.f32 %v447_v17 }
 0x31a   :  { %v811_v18 = vpop.eup %810 }
 0x31b   :  { %v450_v19 = vpack.c.bf16 %v811_v18, %v811_v18 }
 0x31d   :  { %592 = vmatmul.mubr.bf16.vlgmr.msra.gmra.mrb[4].mxu0 %v450_v19 }
 0x3f0   :  { %v593_v27 = vpop.f32.mrb[4].mxu0 }
 0x3f1   :  { %v594_v28 = vadd.f32 %v593_v27, %v472_v25  ;;  %v595_v29 = vpop.f32.mrb[5].mxu0 }
 0x3f2   :  { %v596_v30 = vadd.f32 %v595_v29, %v476_v26  ;;  %v597_v31 = vpop.f32.mrb[6].mxu0 }
 0x3f3   :  { %v598_v32 = vpop.f32.mrb[7].mxu0 }
 0x3f4   :  { %v681_v33 = vpack.c.bf16 %v596_v30, %v594_v28 }
 0x3f6   :  { %610 = vst.msk [vmem:[#allocation5] sm:$0xff] %vm609_vm4, %v681_v33 }
 0x3f7   :  { %845 = shalt.err (!%p842_p12)
}
 0x3f8   :  { %s846_s2 = scalar_lea.hbm %s1117_s9, 128 }
 0x3f9   :  { %p847_p13 = scmp.ne.s32.totalorder %s1117_s9, %s846_s2  ;;  %p850_p0 = scmp.lt.u32.totalorder %s846_s2, %s1117_s9 }
 0x3fb   :  { %p852_p1 = pnand %p850_p0, %p847_p13 }
 0x3fd   :  { %855 = shalt.err (!%p852_p1)
}
 0x3fe   :  { %620 = dma.vmem_to_hbm [thread:$0]  %s618_s4, 128, %s1117_s9, [#allocation4]  }
 0x3ff   :  { %858 = dma.done.wait [#allocation4], 128  }
 0x400   :  { %859 = vsyncadd [#allocation4], 4294967168 }
 0x401   :  { %624 = vsyncpa [#allocation3], 1 }
 0x402   :  { %625 = vsyncpa [#allocation4], 1 }

</bundles_post_ra>
